<compile_context>
chip_gen: v5e
topology: v5e:2x2
jax: 0.10.0
libtpu: 0.0.40
codegen_flags: <defaults>
</compile_context>

<pallas_src>
import jax
import jax.numpy as jnp
from jax.experimental import pallas as pl
from jax.experimental.pallas import tpu as pltpu

IN_DIM = 784      # 28 * 28
IN_PAD = 896      # 7 * 128  (lane-aligned feature dim)
N_CLS = 10
CLS_PAD = 128     # lane-dense class dim


def _round_up(n, m):
    return ((n + m - 1) // m) * m


def mnist_kernel(x_ref, w1_ref, b1_ref, w2_ref, b2_ref, o_ref):
    # x_ref : (TB, IN_PAD)       bfloat16
    # w1_ref: (IN_PAD, H)        bfloat16   (resident across batch tiles)
    # b1_ref: (1, H)             float32
    # w2_ref: (H, CLS_PAD)       bfloat16   (resident across batch tiles)
    # b2_ref: (1, CLS_PAD)       float32    (padded classes = -1e30)
    # o_ref : (TB, CLS_PAD)      float32    (log-probabilities; cols >= 10 are junk)

    # Linear 1 (bf16 MXU inputs, f32 accumulation) + bias + ReLU in f32
    h = jnp.dot(x_ref[...], w1_ref[...], preferred_element_type=jnp.float32)
    h = jnp.maximum(h + b1_ref[...], 0.0)

    # Dropout(0.2): identity in eval mode.

    # Linear 2 (cast activations to bf16 only at the MXU input)
    logits = jnp.dot(h.astype(w2_ref.dtype), w2_ref[...],
                     preferred_element_type=jnp.float32) + b2_ref[...]

    # LogSoftmax over the (padded) class dim; padded columns carry -1e30 so
    # they contribute nothing to max / logsumexp.
    m = jnp.max(logits, axis=-1, keepdims=True)
    z = logits - m
    lse = jnp.log(jnp.sum(jnp.exp(z), axis=-1, keepdims=True))
    o_ref[...] = z - lse


def mnist_forward(x_nchw, w1, b1, w2, b2, *, batch_tile=None):
    """x_nchw: (B, 1, 28, 28) float32  ->  (B, 10) float32 log-probs."""
    B = x_nchw.shape[0]
    hidden = w1.shape[1]

    # nn.Flatten() + lane-align the feature dim (784 -> 896).
    x_flat = x_nchw.reshape(B, -1).astype(jnp.float32)
    x_flat = jnp.pad(x_flat, ((0, 0), (0, IN_PAD - IN_DIM)))

    # Batch tile: >= 256 rows for real batches, bounded at 512 so the bf16
    # x tile (+double buffer) + weights stay far under v7x's 32 MiB scoped VMEM.
    if batch_tile is None:
        batch_tile = 256 if B >= 256 else _round_up(B, 8)
    tb = min(batch_tile, 512)
    b_pad = _round_up(max(B, tb), tb)
    if b_pad != B:
        x_flat = jnp.pad(x_flat, ((0, b_pad - B), (0, 0)))

    # bf16 MXU operands; biases stay f32.
    x_bf = x_flat.astype(jnp.bfloat16)
    w1_p = jnp.pad(w1.astype(jnp.float32),
                   ((0, IN_PAD - IN_DIM), (0, 0))).astype(jnp.bfloat16)
    w2_p = jnp.pad(w2.astype(jnp.float32),
                   ((0, 0), (0, CLS_PAD - N_CLS))).astype(jnp.bfloat16)
    b1_p = b1.astype(jnp.float32).reshape(1, hidden)
    # Push padded-class logits to -inf-ish so the softmax normalizer is correct.
    b2_p = jnp.full((1, CLS_PAD), -1e30, dtype=jnp.float32)
    b2_p = b2_p.at[0, :N_CLS].set(b2.astype(jnp.float32))

    out_padded = pl.pallas_call(
        mnist_kernel,
        out_shape=jax.ShapeDtypeStruct((b_pad, CLS_PAD), jnp.float32),
        grid=(b_pad // tb,),
        in_specs=[
            pl.BlockSpec((tb, IN_PAD), lambda i: (i, 0)),       # x: tiled over batch
            pl.BlockSpec((IN_PAD, hidden), lambda i: (0, 0)),   # w1: resident
            pl.BlockSpec((1, hidden), lambda i: (0, 0)),        # b1: resident
            pl.BlockSpec((hidden, CLS_PAD), lambda i: (0, 0)),  # w2: resident
            pl.BlockSpec((1, CLS_PAD), lambda i: (0, 0)),       # b2: resident
        ],
        out_specs=pl.BlockSpec((tb, CLS_PAD), lambda i: (i, 0)),
        compiler_params=pltpu.CompilerParams(
            dimension_semantics=("parallel",)),
    )(x_bf, w1_p, b1_p, w2_p, b2_p)

    return out_padded[:B, :N_CLS]


def init_params(key, hidden_size=256):
    """Deterministic PyTorch-style (Kaiming-uniform-ish) init."""
    k1, k2, k3, k4 = jax.random.split(key, 4)
    bound1 = 1.0 / (IN_DIM ** 0.5)
    bound2 = 1.0 / (hidden_size ** 0.5)
    w1 = jax.random.uniform(k1, (IN_DIM, hidden_size), jnp.float32, -bound1, bound1)
    b1 = jax.random.uniform(k2, (hidden_size,), jnp.float32, -bound1, bound1)
    w2 = jax.random.uniform(k3, (hidden_size, N_CLS), jnp.float32, -bound2, bound2)
    b2 = jax.random.uniform(k4, (N_CLS,), jnp.float32, -bound2, bound2)
    return w1, b1, w2, b2


if __name__ == "__main__":
    key = jax.random.PRNGKey(0)
    k_x, k_p = jax.random.split(key)

    # Small MNIST-shaped batch: (B, C, H, W) = (8, 1, 28, 28)
    B, hidden_size = 8, 256
    x = jax.random.normal(k_x, (B, 1, 28, 28), dtype=jnp.float32)
    w1, b1, w2, b2 = init_params(k_p, hidden_size)

    out = jax.block_until_ready(mnist_forward(x, w1, b1, w2, b2))
    assert out.shape == (B, N_CLS)

    # Pure-JAX reference (eval-mode forward) using the same bf16-rounded MXU
    # inputs as the kernel, f32 accumulation / epilogue.
    x_flat = x.reshape(B, -1)
    xr = x_flat.astype(jnp.bfloat16).astype(jnp.float32)
    w1r = w1.astype(jnp.bfloat16).astype(jnp.float32)
    w2r = w2.astype(jnp.bfloat16).astype(jnp.float32)
    h = jnp.maximum(xr @ w1r + b1, 0.0)
    logits = h.astype(jnp.bfloat16).astype(jnp.float32) @ w2r + b2
    ref = jax.nn.log_softmax(logits, axis=1)

    err = float(jnp.max(jnp.abs(out - ref)))
    assert err < 1e-2, f"mismatch vs reference: max abs err {err}"
    # log-probs must normalize
    assert float(jnp.max(jnp.abs(jnp.sum(jnp.exp(out), axis=1) - 1.0))) < 1e-3

    print("KERNEL_OK")
</pallas_src>

<mosaic_0001>
module attributes {stable_mosaic.version = 11 : i64} {
  func.func @mnist_kernel(%arg0: i32, %arg1: memref<8x896xbf16, #tpu.memory_space<vmem>>, %arg2: memref<896x256xbf16, #tpu.memory_space<vmem>>, %arg3: memref<1x256xf32, #tpu.memory_space<vmem>>, %arg4: memref<256x128xbf16, #tpu.memory_space<vmem>>, %arg5: memref<1x128xf32, #tpu.memory_space<vmem>>, %arg6: memref<8x128xf32, #tpu.memory_space<vmem>>) attributes {dimension_semantics = [#tpu.dimension_semantics<parallel>], iteration_bounds = array<i64: 1>, scalar_prefetch = 0 : i64, scratch_operands = 0 : i64, tpu.core_type = #tpu.core_type<tc>, window_params = [{transform_indices = @transform_0, window_bounds = array<i64: 8, 896>}, {pipeline_mode = #tpu.pipeline_mode<synchronous>, transform_indices = @transform_1, window_bounds = array<i64: 896, 256>}, {pipeline_mode = #tpu.pipeline_mode<synchronous>, transform_indices = @transform_2, window_bounds = array<i64: 1, 256>}, {pipeline_mode = #tpu.pipeline_mode<synchronous>, transform_indices = @transform_3, window_bounds = array<i64: 256, 128>}, {pipeline_mode = #tpu.pipeline_mode<synchronous>, transform_indices = @transform_4, window_bounds = array<i64: 1, 128>}, {transform_indices = @transform_5, window_bounds = array<i64: 8, 128>}]} {
    %c0 = arith.constant 0 : index
    %c0_0 = arith.constant 0 : index
    %0 = vector.load %arg1[%c0, %c0_0] : memref<8x896xbf16, #tpu.memory_space<vmem>>, vector<8x896xbf16>
    %c0_1 = arith.constant 0 : index
    %c0_2 = arith.constant 0 : index
    %1 = vector.load %arg2[%c0_1, %c0_2] : memref<896x256xbf16, #tpu.memory_space<vmem>>, vector<896x256xbf16>
    %cst = arith.constant dense<0.000000e+00> : vector<8x256xf32>
    %2 = tpu.matmul %0, %1, %cst {dimension_numbers = #tpu.dot_dimension_numbers<[1], [0], [0], [1], [0, 0, 1, 1], [], []>} : vector<8x896xbf16>, vector<896x256xbf16>, vector<8x256xf32> -> vector<8x256xf32>
    %c0_3 = arith.constant 0 : index
    %c0_4 = arith.constant 0 : index
    %3 = vector.load %arg3[%c0_3, %c0_4] : memref<1x256xf32, #tpu.memory_space<vmem>>, vector<1x256xf32>
    %4 = vector.broadcast %3 : vector<1x256xf32> to vector<8x256xf32>
    %5 = arith.addf %2, %4 : vector<8x256xf32>
    %cst_5 = arith.constant 0.000000e+00 : f32
    %6 = vector.broadcast %cst_5 : f32 to vector<8x256xf32>
    %7 = arith.maximumf %5, %6 : vector<8x256xf32>
    %8 = arith.truncf %7 : vector<8x256xf32> to vector<8x256xbf16>
    %c0_6 = arith.constant 0 : index
    %c0_7 = arith.constant 0 : index
    %9 = vector.load %arg4[%c0_6, %c0_7] : memref<256x128xbf16, #tpu.memory_space<vmem>>, vector<256x128xbf16>
    %cst_8 = arith.constant dense<0.000000e+00> : vector<8x128xf32>
    %10 = tpu.matmul %8, %9, %cst_8 {dimension_numbers = #tpu.dot_dimension_numbers<[1], [0], [0], [1], [0, 0, 1, 1], [], []>} : vector<8x256xbf16>, vector<256x128xbf16>, vector<8x128xf32> -> vector<8x128xf32>
    %c0_9 = arith.constant 0 : index
    %c0_10 = arith.constant 0 : index
    %11 = vector.load %arg5[%c0_9, %c0_10] : memref<1x128xf32, #tpu.memory_space<vmem>>, vector<1x128xf32>
    %12 = vector.broadcast %11 : vector<1x128xf32> to vector<8x128xf32>
    %13 = arith.addf %10, %12 : vector<8x128xf32>
    %cst_11 = arith.constant dense<0xFF800000> : vector<8xf32>
    %14 = vector.multi_reduction <maximumf>, %13, %cst_11 [1] : vector<8x128xf32> to vector<8xf32>
    %15 = vector.shape_cast %14 : vector<8xf32> to vector<8x1xf32>
    %16 = vector.broadcast %15 : vector<8x1xf32> to vector<8x128xf32>
    %17 = arith.subf %13, %16 : vector<8x128xf32>
    %18 = math.exp %17 : vector<8x128xf32>
    %cst_12 = arith.constant dense<0.000000e+00> : vector<8xf32>
    %19 = vector.multi_reduction <add>, %18, %cst_12 [1] : vector<8x128xf32> to vector<8xf32>
    %20 = vector.shape_cast %19 : vector<8xf32> to vector<8x1xf32>
    %21 = math.log %20 : vector<8x1xf32>
    %22 = vector.broadcast %21 : vector<8x1xf32> to vector<8x128xf32>
    %23 = arith.subf %17, %22 : vector<8x128xf32>
    %c0_13 = arith.constant 0 : index
    %c0_14 = arith.constant 0 : index
    %24 = vector.load %arg6[%c0_13, %c0_14] : memref<8x128xf32, #tpu.memory_space<vmem>>, vector<8x128xf32>
    tpu.vector_store %arg6[%c0_13, %c0_14], %23 {strides = array<i32>} : memref<8x128xf32, #tpu.memory_space<vmem>>, vector<8x128xf32>,
    return
  }
  func.func @transform_0(%arg0: i32) -> (i32, i32) {
    %c0_i32 = arith.constant 0 : i32
    %c0_i32_0 = arith.constant 0 : i32
    return %arg0, %c0_i32 : i32, i32
  }
  func.func @transform_1(%arg0: i32) -> (i32, i32) {
    %c0_i32 = arith.constant 0 : i32
    %c0_i32_0 = arith.constant 0 : i32
    %c0_i32_1 = arith.constant 0 : i32
    return %c0_i32, %c0_i32_0 : i32, i32
  }
  func.func @transform_2(%arg0: i32) -> (i32, i32) {
    %c0_i32 = arith.constant 0 : i32
    %c0_i32_0 = arith.constant 0 : i32
    %c0_i32_1 = arith.constant 0 : i32
    return %c0_i32, %c0_i32_0 : i32, i32
  }
  func.func @transform_3(%arg0: i32) -> (i32, i32) {
    %c0_i32 = arith.constant 0 : i32
    %c0_i32_0 = arith.constant 0 : i32
    %c0_i32_1 = arith.constant 0 : i32
    return %c0_i32, %c0_i32_0 : i32, i32
  }
  func.func @transform_4(%arg0: i32) -> (i32, i32) {
    %c0_i32 = arith.constant 0 : i32
    %c0_i32_0 = arith.constant 0 : i32
    %c0_i32_1 = arith.constant 0 : i32
    return %c0_i32, %c0_i32_0 : i32, i32
  }
  func.func @transform_5(%arg0: i32) -> (i32, i32) {
    %c0_i32 = arith.constant 0 : i32
    %c0_i32_0 = arith.constant 0 : i32
    return %arg0, %c0_i32 : i32, i32
  }
}

</mosaic_0001>

<bundles_post_ra>
// kernel: tpu_custom_call.1
= control target key start
LH: loop header
LB: loop body
LE: loop exit
PB: predicated region body
PF: predicated region fallthrough
CT: control target
= control target key end

     0   :  { %10 = vsyncpa [#allocation3], 0  ;;  %s2028_s0 = inlined_call_operand.hbm [shape: bf16[8,896], index: 0, kind: input, shape index: {}]   ;;  %s2029_s1 = inlined_call_operand.hbm [shape: bf16[896,256], index: 1, kind: input, shape index: {}]   ;;  %s2030_s2 = inlined_call_operand.hbm [shape: f32[1,256], index: 2, kind: input, shape index: {}]   ;;  %s2031_s3 = inlined_call_operand.hbm [shape: bf16[256,128], index: 3, kind: input, shape index: {}]   ;;  %s2032_s4 = inlined_call_operand.vmem [shape: f32[1,128], index: 4, kind: input, shape index: {}]   ;;  %s2033_s5 = inlined_call_operand.hbm [shape: f32[8,128], index: 5, kind: output, shape index: {}]  }
   0x1   :  { %11 = vsyncpa [#allocation6], 0 }
   0x2   :  { %12 = vsyncpa [#allocation9], 0  ;;  %s29_s20 = sshll.u32 %s2029_s1, 4  ;;  %s30_s20 = int_to_ptr.hbm [resolvable:$true] %s29_s20 }
   0x3   :  { %13 = vsyncpa [#allocation4], 0  ;;  %s1943_s21 = smov [#allocation5]   ;;  %s19_s25 = sshll.u32 %s2028_s0, 4  ;;  %s20_s25 = int_to_ptr.hbm [resolvable:$true] %s19_s25 }
   0x4   :  { %s31_s22 = sshll.u32 %s1943_s21, 4  ;;  %s1944_s26 = smov 128   ;;  %s32_s22 = int_to_ptr.vmem [resolvable:$true] %s31_s22 }
   0x5   :  { %s1945_s27 = smov 8   ;;  %s1946_s28 = smov [#allocation2]  }
   0x6   :  { %37 = dma.hbm_to_vmem [thread:$0]  %s30_s20, 14336, %s32_s22, [#allocation6], %s1944_s26, %s1944_s26, %s1945_s27  }
   0x7   :  { %s21_s29 = sshll.u32 %s1946_s28, 4  ;;  %s43_s7 = sshll.u32 %s2030_s2, 4  ;;  %s22_s29 = int_to_ptr.vmem [resolvable:$true] %s21_s29  ;;  %s44_s7 = int_to_ptr.hbm [resolvable:$true] %s43_s7 }
   0x8   :  { %24 = dma.hbm_to_vmem [thread:$0]  %s20_s25, 448, %s22_s29, [#allocation3]  }
   0x9   :  { %s53_s9 = sshll.u32 %s2031_s3, 4  ;;  %s1947_s10 = smov [#allocation7]   ;;  %s54_s9 = int_to_ptr.hbm [resolvable:$true] %s53_s9 }
   0xa   :  { %s45_s11 = sshll.u32 %s1947_s10, 4  ;;  %s1948_s0 = smov [#allocation8]   ;;  %s46_s11 = int_to_ptr.vmem [resolvable:$true] %s45_s11 }
   0xb   :  { %48 = dma.hbm_to_vmem [thread:$0]  %s44_s7, 32, %s46_s11, [#allocation6]  }
   0xc   :  { %s55_s12 = sshll.u32 %s1948_s0, 4  ;;  %s1949_s13 = smov 64   ;;  %s56_s12 = int_to_ptr.vmem [resolvable:$true] %s55_s12 }
   0xd   :  { %s1950_s14 = smov 4  }
   0xe   :  { %61 = dma.hbm_to_vmem [thread:$0]  %s54_s9, 2048, %s56_s12, [#allocation9], %s1949_s13, %s1949_s13, %s1950_s14  }
   0xf   :  { %1935 = dma.done.wait [#allocation3], 448  }
  0x10   :  { %1936 = vsyncadd [#allocation3], 4294966848 }
  0x11   :  { %1937 = dma.done.wait [#allocation6], 14368  }
  0x12   :  { %1938 = vsyncadd [#allocation6], 4294952928 }
  0x13   :  { %1939 = dma.done.wait [#allocation9], 2048  }
  0x14   :  { %1940 = vsyncadd [#allocation9], 4294965248  ;;  %v1219_v0 = vld [vmem:[#allocation5 + $0x70] sm:$0xf]  ;;  %v1688_v1 = vld [vmem:[#allocation5 + $0x74] sm:$0xf0] }
  0x15   :  { %v1283_v2 = vld [vmem:[#allocation5 + $0xf0] sm:$0xf]  ;;  %v1220_v3 = vor.u32 %v1688_v1, %v1219_v0  ;;  %v1704_v4 = vld [vmem:[#allocation5 + $0xf4] sm:$0xf0]  ;;  %v1211_v9 = vld [vmem:[#allocation5 + $0x60] sm:$0xf] }
  0x16   :  { %v1347_v5 = vld [vmem:[#allocation5 + $0x170] sm:$0xf]  ;;  %v1720_v6 = vld [vmem:[#allocation5 + $0x174] sm:$0xf0]  ;;  %v1284_v7 = vor.u32 %v1704_v4, %v1283_v2  ;;  %v1686_v10 = vld [vmem:[#allocation5 + $0x64] sm:$0xf0] }
  0x17   :  { %v1348_v8 = vor.u32 %v1720_v6, %v1347_v5  ;;  %v1275_v11 = vld [vmem:[#allocation5 + $0xe0] sm:$0xf]  ;;  %787 = vmatpush.bf16.msra.mxu0 %v1220_v3  ;;  %v1212_v12 = vor.u32 %v1686_v10, %v1211_v9  ;;  %v1702_v13 = vld [vmem:[#allocation5 + $0xe4] sm:$0xf0]  ;;  %v1203_v18 = vld [vmem:[#allocation5 + $0x50] sm:$0xf] }
  0x18   :  { %v1339_v14 = vld [vmem:[#allocation5 + $0x160] sm:$0xf]  ;;  %v1718_v15 = vld [vmem:[#allocation5 + $0x164] sm:$0xf0]  ;;  %800 = vmatpush.bf16.msra.mxu1 %v1284_v7  ;;  %v1276_v16 = vor.u32 %v1702_v13, %v1275_v11  ;;  %v1684_v19 = vld [vmem:[#allocation5 + $0x54] sm:$0xf0] }
  0x19   :  { %813 = vmatpush.bf16.msra.mxu2 %v1348_v8  ;;  %v1340_v17 = vor.u32 %v1718_v15, %v1339_v14  ;;  %v1267_v20 = vld [vmem:[#allocation5 + $0xd0] sm:$0xf]  ;;  %v1700_v21 = vld [vmem:[#allocation5 + $0xd4] sm:$0xf0]  ;;  %v1204_v24 = vor.u32 %v1684_v19, %v1203_v18  ;;  %v1195_v25 = vld [vmem:[#allocation5 + $0x40] sm:$0xf] }
  0x1a   :  { %v1331_v22 = vld [vmem:[#allocation5 + $0x150] sm:$0xf]  ;;  %v1716_v23 = vld [vmem:[#allocation5 + $0x154] sm:$0xf0]  ;;  %v1682_v26 = vld [vmem:[#allocation5 + $0x44] sm:$0xf0]  ;;  %v1268_v27 = vor.u32 %v1700_v21, %v1267_v20 }
  0x1b   :  { %788 = vmatpush.bf16.msra.mxu0 %v1212_v12  ;;  %v1332_v28 = vor.u32 %v1716_v23, %v1331_v22  ;;  %v1259_v29 = vld [vmem:[#allocation5 + $0xc0] sm:$0xf]  ;;  %v1411_v30 = vld [vmem:[#allocation5 + $0x1f0] sm:$0xf]  ;;  %v1736_v31 = vld [vmem:[#allocation5 + $0x1f4] sm:$0xf0]  ;;  %v1196_v37 = vor.u32 %v1682_v26, %v1195_v25 }
  0x1c   :  { %801 = vmatpush.bf16.msra.mxu1 %v1276_v16  ;;  %v1698_v32 = vld [vmem:[#allocation5 + $0xc4] sm:$0xf0]  ;;  %v1323_v33 = vld [vmem:[#allocation5 + $0x140] sm:$0xf]  ;;  %v1412_v35 = vor.u32 %v1736_v31, %v1411_v30  ;;  %v1187_v38 = vld [vmem:[#allocation5 + $0x30] sm:$0xf] }
  0x1d   :  { %814 = vmatpush.bf16.msra.mxu2 %v1340_v17  ;;  %v1714_v34 = vld [vmem:[#allocation5 + $0x144] sm:$0xf0]  ;;  %v1403_v36 = vld [vmem:[#allocation5 + $0x1e0] sm:$0xf]  ;;  %v1680_v39 = vld [vmem:[#allocation5 + $0x34] sm:$0xf0]  ;;  %v1260_v41 = vor.u32 %v1698_v32, %v1259_v29 }
  0x1e   :  { %826 = vmatpush.bf16.msra.mxu3 %v1412_v35  ;;  %v1734_v40 = vld [vmem:[#allocation5 + $0x1e4] sm:$0xf0]  ;;  %v1324_v42 = vor.u32 %v1714_v34, %v1323_v33  ;;  %v1251_v43 = vld [vmem:[#allocation5 + $0xb0] sm:$0xf]  ;;  %v1696_v44 = vld [vmem:[#allocation5 + $0xb4] sm:$0xf0]  ;;  %v1188_v50 = vor.u32 %v1680_v39, %v1187_v38 }
  0x1f   :  { %789 = vmatpush.bf16.msra.mxu0 %v1204_v24  ;;  %v1315_v45 = vld [vmem:[#allocation5 + $0x130] sm:$0xf]  ;;  %v1404_v46 = vor.u32 %v1734_v40, %v1403_v36  ;;  %v1712_v47 = vld [vmem:[#allocation5 + $0x134] sm:$0xf0]  ;;  %v1179_v51 = vld [vmem:[#allocation5 + $0x20] sm:$0xf]  ;;  %v1252_v54 = vor.u32 %v1696_v44, %v1251_v43 }
  0x20   :  { %802 = vmatpush.bf16.msra.mxu1 %v1268_v27  ;;  %v1395_v48 = vld [vmem:[#allocation5 + $0x1d0] sm:$0xf]  ;;  %v1732_v49 = vld [vmem:[#allocation5 + $0x1d4] sm:$0xf0]  ;;  %v1678_v52 = vld [vmem:[#allocation5 + $0x24] sm:$0xf0]  ;;  %v1316_v55 = vor.u32 %v1712_v47, %v1315_v45 }
  0x21   :  { %815 = vmatpush.bf16.msra.mxu2 %v1332_v28  ;;  %v1396_v53 = vor.u32 %v1732_v49, %v1395_v48  ;;  %v1243_v56 = vld [vmem:[#allocation5 + $0xa0] sm:$0xf]  ;;  %v1730_v58 = vld [vmem:[#allocation5 + $0x1c4] sm:$0xf0]  ;;  %v1180_v62 = vor.u32 %v1678_v52, %v1179_v51  ;;  %v1171_v63 = vld [vmem:[#allocation5 + $0x10] sm:$0xf] }
  0x22   :  { %827 = vmatpush.bf16.msra.mxu3 %v1404_v46  ;;  %v1387_v57 = vld [vmem:[#allocation5 + $0x1c0] sm:$0xf]  ;;  %v1694_v59 = vld [vmem:[#allocation5 + $0xa4] sm:$0xf0]  ;;  %v1676_v0 = vld [vmem:[#allocation5 + $0x14] sm:$0xf0] }
  0x23   :  { %790 = vmatpush.bf16.msra.mxu0 %v1196_v37  ;;  %v1307_v60 = vld [vmem:[#allocation5 + $0x120] sm:$0xf]  ;;  %v1710_v61 = vld [vmem:[#allocation5 + $0x124] sm:$0xf0]  ;;  %v1388_v1 = vor.u32 %v1730_v58, %v1387_v57  ;;  %v1244_v2 = vor.u32 %v1694_v59, %v1243_v56  ;;  %v1235_v4 = vld [vmem:[#allocation5 + $0x90] sm:$0xf]  ;;  %v1172_v10 = vor.u32 %v1676_v0, %v1171_v63 }
  0x24   :  { %803 = vmatpush.bf16.msra.mxu1 %v1260_v41  ;;  %v1308_v3 = vor.u32 %v1710_v61, %v1307_v60  ;;  %v1379_v5 = vld [vmem:[#allocation5 + $0x1b0] sm:$0xf]  ;;  %v1728_v6 = vld [vmem:[#allocation5 + $0x1b4] sm:$0xf0]  ;;  %v1163_v11 = vld [vmem:[#allocation5] sm:$0xf] }
  0x25   :  { %816 = vmatpush.bf16.msra.mxu2 %v1324_v42  ;;  %v1692_v7 = vld [vmem:[#allocation5 + $0x94] sm:$0xf0]  ;;  %v1299_v8 = vld [vmem:[#allocation5 + $0x110] sm:$0xf]  ;;  %v1674_v12 = vld [vmem:[#allocation5 + $0x4] sm:$0xf0]  ;;  %v1380_v14 = vor.u32 %v1728_v6, %v1379_v5 }
  0x26   :  { %828 = vmatpush.bf16.msra.mxu3 %v1396_v53  ;;  %v1708_v9 = vld [vmem:[#allocation5 + $0x114] sm:$0xf0]  ;;  %v1227_v13 = vld [vmem:[#allocation5 + $0x80] sm:$0xf]  ;;  %v1236_v15 = vor.u32 %v1692_v7, %v1235_v4  ;;  %v1690_v17 = vld [vmem:[#allocation5 + $0x84] sm:$0xf0]  ;;  %v1164_v26 = vor.u32 %v1674_v12, %v1163_v11 }
  0x27   :  { %791 = vmatpush.bf16.msra.mxu0 %v1188_v50  ;;  %v1300_v16 = vor.u32 %v1708_v9, %v1299_v8  ;;  %v1371_v18 = vld [vmem:[#allocation5 + $0x1a0] sm:$0xf]  ;;  %v1726_v19 = vld [vmem:[#allocation5 + $0x1a4] sm:$0xf0]  ;;  %v1475_v22 = vld [vmem:[#allocation5 + $0x270] sm:$0xf]  ;;  %v1228_v30 = vor.u32 %v1690_v17, %v1227_v13 }
  0x28   :  { %804 = vmatpush.bf16.msra.mxu1 %v1252_v54  ;;  %v1291_v20 = vld [vmem:[#allocation5 + $0x100] sm:$0xf]  ;;  %v1706_v21 = vld [vmem:[#allocation5 + $0x104] sm:$0xf0]  ;;  %v1752_v23 = vld [vmem:[#allocation5 + $0x274] sm:$0xf0]  ;;  %v1372_v29 = vor.u32 %v1726_v19, %v1371_v18 }
  0x29   :  { %817 = vmatpush.bf16.msra.mxu2 %v1316_v55  ;;  %v1539_v24 = vld [vmem:[#allocation5 + $0x2f0] sm:$0xf]  ;;  %v1768_v25 = vld [vmem:[#allocation5 + $0x2f4] sm:$0xf0]  ;;  %v1292_v31 = vor.u32 %v1706_v21, %v1291_v20  ;;  %v1476_v34 = vor.u32 %v1752_v23, %v1475_v22  ;;  %v1467_v36 = vld [vmem:[#allocation5 + $0x260] sm:$0xf] }
  0x2a   :  { %829 = vmatpush.bf16.msra.mxu3 %v1388_v1  ;;  %v1603_v27 = vld [vmem:[#allocation5 + $0x370] sm:$0xf]  ;;  %v1784_v28 = vld [vmem:[#allocation5 + $0x374] sm:$0xf0]  ;;  %v1540_v35 = vor.u32 %v1768_v25, %v1539_v24  ;;  %v1750_v37 = vld [vmem:[#allocation5 + $0x264] sm:$0xf0] }
  0x2b   :  { %792 = vmatpush.bf16.msra.mxu0 %v1180_v62  ;;  %v1363_v32 = vld [vmem:[#allocation5 + $0x190] sm:$0xf]  ;;  %v1724_v33 = vld [vmem:[#allocation5 + $0x194] sm:$0xf0]  ;;  %v1604_v38 = vor.u32 %v1784_v28, %v1603_v27  ;;  %v1531_v39 = vld [vmem:[#allocation5 + $0x2e0] sm:$0xf]  ;;  %v1468_v46 = vor.u32 %v1750_v37, %v1467_v36 }
  0x2c   :  { %805 = vmatpush.bf16.msra.mxu1 %v1244_v2  ;;  %v1766_v40 = vld [vmem:[#allocation5 + $0x2e4] sm:$0xf0]  ;;  %v81_v41 = vld [vmem:[#allocation2 + $0x8] sm:$0xff]  ;;  %v1595_v42 = vld [vmem:[#allocation5 + $0x360] sm:$0xf]  ;;  %v1364_v44 = vor.u32 %v1724_v33, %v1363_v32  ;;  %s1951_s15 = smov [#allocation10]  }
  0x2d   :  { %818 = vmatpush.bf16.msra.mxu2 %v1308_v3  ;;  %v1782_v43 = vld [vmem:[#allocation5 + $0x364] sm:$0xf0]  ;;  %v208_v45 = vunpack.c.l.b16 %v81_v41  ;;  %v1355_v47 = vld [vmem:[#allocation5 + $0x180] sm:$0xf]  ;;  %v1532_v50 = vor.u32 %v1766_v40, %v1531_v39  ;;  %v1459_v51 = vld [vmem:[#allocation5 + $0x250] sm:$0xf]  ;;  %v209_v61 = vunpack.c.h.b16 %v81_v41 }
  0x2e   :  { %830 = vmatpush.bf16.msra.mxu3 %v1380_v14  ;;  %v1722_v48 = vld [vmem:[#allocation5 + $0x184] sm:$0xf0]  ;;  %v1687_v52 = vld [vmem:[#allocation5 + $0x74] sm:$0xf]  ;;  %v1221_v53 = vld [vmem:[#allocation5 + $0x78] sm:$0xf0]  ;;  %v1596_v57 = vor.u32 %v1782_v43, %v1595_v42 }
  0x2f   :  { %793 = vmatpush.bf16.msra.mxu0 %v1172_v10  ;;  %v80_v49 = vld [vmem:[#allocation2] sm:$0xff]  ;;  %v1994_v54 = vpack.c.b16 %v208_v45, %v208_v45  ;;  %v1748_v58 = vld [vmem:[#allocation5 + $0x254] sm:$0xf0]  ;;  %v1523_v59 = vld [vmem:[#allocation5 + $0x2d0] sm:$0xf]  ;;  %v1356_v0 = vor.u32 %v1722_v48, %v1355_v47  ;;  %v1224_v3 = vor.u32 %v1687_v52, %v1221_v53  ;;  %v2002_v13 = vpack.c.b16 %v209_v61, %v209_v61  ;;  %s1147_s16 = sshll.u32 %s1951_s15, 4  ;;  %s1148_s16 = int_to_ptr.vmem [resolvable:$true] %s1147_s16 }
  0x30   :  { %806 = vmatpush.bf16.msra.mxu1 %v1236_v15  ;;  %v206_v55 = vunpack.c.l.b16 %v80_v49  ;;  %v207_v56 = vunpack.c.h.b16 %v80_v49  ;;  %v1764_v60 = vld [vmem:[#allocation5 + $0x2d4] sm:$0xf0]  ;;  %v1587_v62 = vld [vmem:[#allocation5 + $0x350] sm:$0xf]  ;;  %v1460_v4 = vor.u32 %v1748_v58, %v1459_v51  ;;  %v1451_v6 = vld [vmem:[#allocation5 + $0x240] sm:$0xf] }
  0x31   :  { %819 = vmatpush.bf16.msra.mxu2 %v1300_v16  ;;  %v1780_v63 = vld [vmem:[#allocation5 + $0x354] sm:$0xf0]  ;;  %v1524_v5 = vor.u32 %v1764_v60, %v1523_v59  ;;  %v1685_v7 = vld [vmem:[#allocation5 + $0x64] sm:$0xf]  ;;  %v1213_v8 = vld [vmem:[#allocation5 + $0x68] sm:$0xf0] }
  0x32   :  { %831 = vmatpush.bf16.msra.mxu3 %v1372_v29  ;;  %v1997_v1 = vpack.c.b16 %v206_v55, %v206_v55  ;;  %v1999_v2 = vpack.c.b16 %v207_v56, %v207_v56  ;;  %v1588_v9 = vor.u32 %v1780_v63, %v1587_v62  ;;  %v1746_v10 = vld [vmem:[#allocation5 + $0x244] sm:$0xf0]  ;;  %v1515_v11 = vld [vmem:[#allocation5 + $0x2c0] sm:$0xf]  ;;  %v1216_v16 = vor.u32 %v1685_v7, %v1213_v8  ;;  %v1443_v19 = vld [vmem:[#allocation5 + $0x230] sm:$0xf] }
  0x33   :  { %794 = vmatpush.bf16.msra.mxu0 %v1164_v26  ;;  %v1762_v12 = vld [vmem:[#allocation5 + $0x2c4] sm:$0xf0]  ;;  %v1579_v14 = vld [vmem:[#allocation5 + $0x340] sm:$0xf]  ;;  %v1452_v17 = vor.u32 %v1746_v10, %v1451_v6  ;;  %v1683_v20 = vld [vmem:[#allocation5 + $0x54] sm:$0xf] }
  0x34   :  { %807 = vmatpush.bf16.msra.mxu1 %v1228_v30  ;;  %v1778_v15 = vld [vmem:[#allocation5 + $0x344] sm:$0xf0]  ;;  %v1516_v18 = vor.u32 %v1762_v12, %v1515_v11  ;;  %v1205_v21 = vld [vmem:[#allocation5 + $0x58] sm:$0xf0]  ;;  %v1744_v23 = vld [vmem:[#allocation5 + $0x234] sm:$0xf0] }
  0x35   :  { %820 = vmatpush.bf16.msra.mxu2 %v1292_v31  ;;  %v1580_v22 = vor.u32 %v1778_v15, %v1579_v14  ;;  %v1507_v24 = vld [vmem:[#allocation5 + $0x2b0] sm:$0xf]  ;;  %v1760_v25 = vld [vmem:[#allocation5 + $0x2b4] sm:$0xf0]  ;;  %v1208_v28 = vor.u32 %v1683_v20, %v1205_v21  ;;  %v1444_v29 = vor.u32 %v1744_v23, %v1443_v19  ;;  %v1435_v31 = vld [vmem:[#allocation5 + $0x220] sm:$0xf] }
  0x36   :  { %832 = vmatpush.bf16.msra.mxu3 %v1364_v44  ;;  %795 = vmatmul.bf16.vlgmr.msra.gmra.mxu0 %v1997_v1  ;;  %v1571_v26 = vld [vmem:[#allocation5 + $0x330] sm:$0xf]  ;;  %v1776_v27 = vld [vmem:[#allocation5 + $0x334] sm:$0xf0]  ;;  %v1508_v30 = vor.u32 %v1760_v25, %v1507_v24  ;;  %v1681_v32 = vld [vmem:[#allocation5 + $0x44] sm:$0xf] }
  0x37   :  { %839 = vmatpush.bf16.msrb.mxu0 %v1476_v34  ;;  %808 = vmatmul.bf16.vlgmr.msra.gmra.mxu1 %v1999_v2  ;;  %v1197_v33 = vld [vmem:[#allocation5 + $0x48] sm:$0xf0]  ;;  %v1572_v34 = vor.u32 %v1776_v27, %v1571_v26  ;;  %v1499_v36 = vld [vmem:[#allocation5 + $0x2a0] sm:$0xf]  ;;  %v1758_v37 = vld [vmem:[#allocation5 + $0x2a4] sm:$0xf0] }
  0x38   :  { %852 = vmatpush.bf16.msrb.mxu1 %v1540_v35  ;;  %821 = vmatmul.bf16.vlgmr.msra.gmra.mxu2 %v1994_v54  ;;  %v1742_v35 = vld [vmem:[#allocation5 + $0x224] sm:$0xf0]  ;;  %v1200_v40 = vor.u32 %v1681_v32, %v1197_v33  ;;  %v1500_v42 = vor.u32 %v1758_v37, %v1499_v36  ;;  %v1427_v43 = vld [vmem:[#allocation5 + $0x210] sm:$0xf]  ;;  %v1679_v44 = vld [vmem:[#allocation5 + $0x34] sm:$0xf] }
  0x39   :  { %865 = vmatpush.bf16.msrb.mxu2 %v1604_v38  ;;  %v1563_v38 = vld [vmem:[#allocation5 + $0x320] sm:$0xf]  ;;  %v1774_v39 = vld [vmem:[#allocation5 + $0x324] sm:$0xf0]  ;;  %v1436_v41 = vor.u32 %v1742_v35, %v1435_v31  ;;  %v1189_v45 = vld [vmem:[#allocation5 + $0x38] sm:$0xf0] }
  0x3a   :  { %833 = vmatpush.bf16.msra.mxu3 %v1356_v0  ;;  %v1740_v47 = vld [vmem:[#allocation5 + $0x214] sm:$0xf0]  ;;  %v1491_v48 = vld [vmem:[#allocation5 + $0x290] sm:$0xf]  ;;  %v1419_v52 = vld [vmem:[#allocation5 + $0x200] sm:$0xf] }
  0x3b   :  { %840 = vmatpush.bf16.msrb.mxu0 %v1468_v46  ;;  %v1564_v46 = vor.u32 %v1774_v39, %v1563_v38  ;;  %v1756_v49 = vld [vmem:[#allocation5 + $0x294] sm:$0xf0]  ;;  %v1738_v53 = vld [vmem:[#allocation5 + $0x204] sm:$0xf0]  ;;  %v1483_v55 = vld [vmem:[#allocation5 + $0x280] sm:$0xf]  ;;  %v1428_v58 = vor.u32 %v1740_v47, %v1427_v43 }
  0x3c   :  { %853 = vmatpush.bf16.msrb.mxu1 %v1532_v50  ;;  %v1555_v50 = vld [vmem:[#allocation5 + $0x310] sm:$0xf]  ;;  %v1772_v51 = vld [vmem:[#allocation5 + $0x314] sm:$0xf0]  ;;  %v1754_v56 = vld [vmem:[#allocation5 + $0x284] sm:$0xf0]  ;;  %v1492_v59 = vor.u32 %v1756_v49, %v1491_v48  ;;  %v1420_v15 = vor.u32 %v1738_v53, %v1419_v52 }
  0x3d   :  { %866 = vmatpush.bf16.msrb.mxu2 %v1596_v57  ;;  %834 = vmatmul.bf16.vlgmr.msra.gmra.mxu3 %v2002_v13  ;;  %v1192_v57 = vor.u32 %v1679_v44, %v1189_v45  ;;  %v82_v60 = vld [vmem:[#allocation2 + $0x10] sm:$0xff]  ;;  %v1677_v61 = vld [vmem:[#allocation5 + $0x24] sm:$0xf]  ;;  %v1181_v62 = vld [vmem:[#allocation5 + $0x28] sm:$0xf0]  ;;  %v1556_v63 = vor.u32 %v1772_v51, %v1555_v50 }
  0x3e   :  { %878 = vmatpush.bf16.msrb.mxu3 %v1224_v3  ;;  %v1547_v0 = vld [vmem:[#allocation5 + $0x300] sm:$0xf]  ;;  %v1770_v3 = vld [vmem:[#allocation5 + $0x304] sm:$0xf0]  ;;  %v1285_v6 = vld [vmem:[#allocation5 + $0xf8] sm:$0xf0]  ;;  %v1184_v10 = vor.u32 %v1677_v61, %v1181_v62  ;;  %v211_v11 = vunpack.c.h.b16 %v82_v60 }
  0x3f   :  { %841 = vmatpush.bf16.msrb.mxu0 %v1460_v4  ;;  %v83_v4 = vld [vmem:[#allocation2 + $0x18] sm:$0xf]  ;;  %v1719_v7 = vld [vmem:[#allocation5 + $0x174] sm:$0xf]  ;;  %v1701_v23 = vld [vmem:[#allocation5 + $0xe4] sm:$0xf] }
  0x40   :  { %854 = vmatpush.bf16.msrb.mxu1 %v1524_v5  ;;  %v1703_v5 = vld [vmem:[#allocation5 + $0xf4] sm:$0xf]  ;;  %v1349_v8 = vld [vmem:[#allocation5 + $0x178] sm:$0xf0]  ;;  %v1277_v24 = vld [vmem:[#allocation5 + $0xe8] sm:$0xf0] }
  0x41   :  { %867 = vmatpush.bf16.msrb.mxu2 %v1588_v9  ;;  %v210_v9 = vunpack.c.l.b16 %v82_v60  ;;  %v1735_v12 = vld [vmem:[#allocation5 + $0x1f4] sm:$0xf]  ;;  %v1413_v14 = vld [vmem:[#allocation5 + $0x1f8] sm:$0xf0]  ;;  %v1288_v19 = vor.u32 %v1703_v5, %v1285_v6  ;;  %v1717_v25 = vld [vmem:[#allocation5 + $0x164] sm:$0xf]  ;;  %v1280_v35 = vor.u32 %v1701_v23, %v1277_v24 }
  0x42   :  { %879 = vmatpush.bf16.msrb.mxu3 %v1216_v16  ;;  %v1484_v16 = vor.u32 %v1754_v56, %v1483_v55  ;;  %v1675_v20 = vld [vmem:[#allocation5 + $0x14] sm:$0xf]  ;;  %v1173_v21 = vld [vmem:[#allocation5 + $0x18] sm:$0xf0]  ;;  %v1416_v26 = vor.u32 %v1735_v12, %v1413_v14  ;;  %v1405_v31 = vld [vmem:[#allocation5 + $0x1e8] sm:$0xf0] }
  0x43   :  { %842 = vmatpush.bf16.msrb.mxu0 %v1452_v17  ;;  %v212_v17 = vunpack.c.l.b16 %v83_v4  ;;  %v2006_v27 = vpack.c.b16 %v210_v9, %v210_v9  ;;  %v1176_v33 = vor.u32 %v1675_v20, %v1173_v21  ;;  %v1269_v36 = vld [vmem:[#allocation5 + $0xd8] sm:$0xf0]  ;;  %v1673_v37 = vld [vmem:[#allocation5 + $0x4] sm:$0xf]  ;;  %v1165_v38 = vld [vmem:[#allocation5 + $0x8] sm:$0xf0] }
  0x44   :  { %855 = vmatpush.bf16.msrb.mxu1 %v1516_v18  ;;  %v1548_v18 = vor.u32 %v1770_v3, %v1547_v0  ;;  %v1333_v44 = vld [vmem:[#allocation5 + $0x158] sm:$0xf0]  ;;  %v1731_v45 = vld [vmem:[#allocation5 + $0x1d4] sm:$0xf]  ;;  %v1168_v47 = vor.u32 %v1673_v37, %v1165_v38  ;;  %v1697_v49 = vld [vmem:[#allocation5 + $0xc4] sm:$0xf] }
  0x45   :  { %868 = vmatpush.bf16.msrb.mxu2 %v1580_v22  ;;  %v1352_v22 = vor.u32 %v1719_v7, %v1349_v8  ;;  %v2010_v32 = vpack.c.b16 %v212_v17, %v212_v17  ;;  %v1261_v50 = vld [vmem:[#allocation5 + $0xc8] sm:$0xf0]  ;;  %v1713_v53 = vld [vmem:[#allocation5 + $0x144] sm:$0xf]  ;;  %v1695_v62 = vld [vmem:[#allocation5 + $0xb4] sm:$0xf] }
  0x46   :  { %880 = vmatpush.bf16.msrb.mxu3 %v1208_v28  ;;  %v1341_v28 = vld [vmem:[#allocation5 + $0x168] sm:$0xf0]  ;;  %v1749_v55 = vld [vmem:[#allocation5 + $0x264] sm:$0xf]  ;;  %v1264_v61 = vor.u32 %v1697_v49, %v1261_v50  ;;  %v1711_v4 = vld [vmem:[#allocation5 + $0x134] sm:$0xf] }
  0x47   :  { %843 = vmatpush.bf16.msrb.mxu0 %v1444_v29  ;;  %v2008_v29 = vpack.c.b16 %v211_v11, %v211_v11  ;;  %v1344_v39 = vor.u32 %v1717_v25, %v1341_v28  ;;  %v1469_v56 = vld [vmem:[#allocation5 + $0x268] sm:$0xf0]  ;;  %v1747_v5 = vld [vmem:[#allocation5 + $0x254] sm:$0xf]  ;;  %v1461_v6 = vld [vmem:[#allocation5 + $0x258] sm:$0xf0] }
  0x48   :  { %856 = vmatpush.bf16.msrb.mxu1 %v1508_v30  ;;  %v1733_v30 = vld [vmem:[#allocation5 + $0x1e4] sm:$0xf]  ;;  %v1389_v60 = vld [vmem:[#allocation5 + $0x1c8] sm:$0xf0]  ;;  %v1472_v0 = vor.u32 %v1749_v55, %v1469_v56  ;;  %v1317_v8 = vld [vmem:[#allocation5 + $0x138] sm:$0xf0] }
  0x49   :  { %869 = vmatpush.bf16.msrb.mxu2 %v1572_v34  ;;  %v1699_v34 = vld [vmem:[#allocation5 + $0xd4] sm:$0xf]  ;;  %v1408_v43 = vor.u32 %v1733_v30, %v1405_v31  ;;  %v1693_v12 = vld [vmem:[#allocation5 + $0xa4] sm:$0xf]  ;;  %v1245_v14 = vld [vmem:[#allocation5 + $0xa8] sm:$0xf0] }
  0x4a   :  { %881 = vmatpush.bf16.msrb.mxu3 %v1200_v40  ;;  %v1715_v40 = vld [vmem:[#allocation5 + $0x154] sm:$0xf]  ;;  %v1272_v48 = vor.u32 %v1699_v34, %v1269_v36  ;;  %v1709_v17 = vld [vmem:[#allocation5 + $0x124] sm:$0xf]  ;;  %v1309_v21 = vld [vmem:[#allocation5 + $0x128] sm:$0xf0]  ;;  %v1248_v24 = vor.u32 %v1693_v12, %v1245_v14 }
  0x4b   :  { %844 = vmatpush.bf16.msrb.mxu0 %v1436_v41  ;;  %v1751_v41 = vld [vmem:[#allocation5 + $0x274] sm:$0xf]  ;;  %v1336_v52 = vor.u32 %v1715_v40, %v1333_v44  ;;  %v1373_v23 = vld [vmem:[#allocation5 + $0x1a8] sm:$0xf0]  ;;  %v1237_v25 = vld [vmem:[#allocation5 + $0x98] sm:$0xf0]  ;;  %v1312_v28 = vor.u32 %v1709_v17, %v1309_v21 }
  0x4c   :  { %857 = vmatpush.bf16.msrb.mxu1 %v1500_v42  ;;  %v1477_v42 = vld [vmem:[#allocation5 + $0x278] sm:$0xf0]  ;;  %v1727_v9 = vld [vmem:[#allocation5 + $0x1b4] sm:$0xf]  ;;  %v1229_v40 = vld [vmem:[#allocation5 + $0x88] sm:$0xf0] }
  0x4d   :  { %870 = vmatpush.bf16.msrb.mxu2 %v1564_v46  ;;  %v1397_v46 = vld [vmem:[#allocation5 + $0x1d8] sm:$0xf0]  ;;  %v1480_v51 = vor.u32 %v1751_v41, %v1477_v42  ;;  %v1707_v30 = vld [vmem:[#allocation5 + $0x114] sm:$0xf]  ;;  %v1705_v41 = vld [vmem:[#allocation5 + $0x104] sm:$0xf] }
  0x4e   :  { %882 = vmatpush.bf16.msrb.mxu3 %v1192_v57  ;;  %v1400_v57 = vor.u32 %v1731_v45, %v1397_v46  ;;  %v1743_v31 = vld [vmem:[#allocation5 + $0x234] sm:$0xf]  ;;  %v1365_v37 = vld [vmem:[#allocation5 + $0x198] sm:$0xf0]  ;;  %v1293_v44 = vld [vmem:[#allocation5 + $0x108] sm:$0xf0] }
  0x4f   :  { %845 = vmatpush.bf16.msrb.mxu0 %v1428_v58  ;;  %v1325_v58 = vld [vmem:[#allocation5 + $0x148] sm:$0xf0]  ;;  %v1723_v36 = vld [vmem:[#allocation5 + $0x194] sm:$0xf]  ;;  %v1741_v45 = vld [vmem:[#allocation5 + $0x224] sm:$0xf] }
  0x50   :  { %858 = vmatpush.bf16.msrb.mxu1 %v1492_v59  ;;  %v1729_v59 = vld [vmem:[#allocation5 + $0x1c4] sm:$0xf]  ;;  %v1328_v3 = vor.u32 %v1713_v53, %v1325_v58  ;;  %v1437_v46 = vld [vmem:[#allocation5 + $0x228] sm:$0xf0]  ;;  %v1541_v49 = vld [vmem:[#allocation5 + $0x2f8] sm:$0xf0] }
  0x51   :  { %871 = vmatpush.bf16.msrb.mxu2 %v1556_v63  ;;  %v1253_v63 = vld [vmem:[#allocation5 + $0xb8] sm:$0xf0]  ;;  %v1392_v7 = vor.u32 %v1729_v59, %v1389_v60  ;;  %v1783_v50 = vld [vmem:[#allocation5 + $0x374] sm:$0xf]  ;;  %v1357_v53 = vld [vmem:[#allocation5 + $0x188] sm:$0xf0]  ;;  %v1440_v56 = vor.u32 %v1741_v45, %v1437_v46 }
  0x52   :  { %883 = vmatpush.bf16.msrb.mxu3 %v1184_v10  ;;  %v1381_v10 = vld [vmem:[#allocation5 + $0x1b8] sm:$0xf0]  ;;  %v1256_v11 = vor.u32 %v1695_v62, %v1253_v63  ;;  %v1739_v59 = vld [vmem:[#allocation5 + $0x214] sm:$0xf]  ;;  %v1765_v62 = vld [vmem:[#allocation5 + $0x2e4] sm:$0xf] }
  0x53   :  { %846 = vmatpush.bf16.msrb.mxu0 %v1420_v15  ;;  %v1464_v15 = vor.u32 %v1747_v5, %v1461_v6  ;;  %v1384_v20 = vor.u32 %v1727_v9, %v1381_v10  ;;  %v1429_v60 = vld [vmem:[#allocation5 + $0x218] sm:$0xf0]  ;;  %v1533_v63 = vld [vmem:[#allocation5 + $0x2e8] sm:$0xf0]  ;;  %v1779_v14 = vld [vmem:[#allocation5 + $0x354] sm:$0xf] }
  0x54   :  { %859 = vmatpush.bf16.msrb.mxu1 %v1484_v16  ;;  %v1320_v16 = vor.u32 %v1711_v4, %v1317_v8  ;;  %v1597_v4 = vld [vmem:[#allocation5 + $0x368] sm:$0xf0]  ;;  %v1432_v5 = vor.u32 %v1739_v59, %v1429_v60  ;;  %v1536_v6 = vor.u32 %v1765_v62, %v1533_v63  ;;  %v1792_v9 = vld [vmem:[#allocation8 + $0x38] sm:$0xff]  ;;  %v1777_v21 = vld [vmem:[#allocation5 + $0x344] sm:$0xf] }
  0x55   :  { %872 = vmatpush.bf16.msrb.mxu2 %v1548_v18  ;;  %v1745_v18 = vld [vmem:[#allocation5 + $0x244] sm:$0xf]  ;;  %v1421_v8 = vld [vmem:[#allocation5 + $0x208] sm:$0xf0]  ;;  %v1525_v12 = vld [vmem:[#allocation5 + $0x2d8] sm:$0xf0] }
  0x56   :  { %847 = vmatmul.bf16.vlgmr.msrb.gmra.mxu0 %v2006_v27  ;;  %884 = vmatpush.bf16.msrb.mxu3 %v1176_v33  ;;  %v1445_v33 = vld [vmem:[#allocation5 + $0x238] sm:$0xf0] }
  0x57   :  { %891 = vmatpush.bf16.msra.mxu0 %v1288_v19  ;;  %860 = vmatmul.bf16.vlgmr.msrb.gmra.mxu1 %v2008_v29  ;;  %v1453_v19 = vld [vmem:[#allocation5 + $0x248] sm:$0xf0]  ;;  %v1448_v42 = vor.u32 %v1743_v31, %v1445_v33  ;;  %v1773_v31 = vld [vmem:[#allocation5 + $0x324] sm:$0xf] }
  0x58   :  { %904 = vmatpush.bf16.msra.mxu1 %v1352_v22  ;;  %873 = vmatmul.bf16.vlgmr.msrb.gmra.mxu2 %v2010_v32  ;;  %v1725_v22 = vld [vmem:[#allocation5 + $0x1a4] sm:$0xf]  ;;  %v1565_v33 = vld [vmem:[#allocation5 + $0x328] sm:$0xf0] }
  0x59   :  { %917 = vmatpush.bf16.msra.mxu2 %v1416_v26  ;;  %v1456_v26 = vor.u32 %v1745_v18, %v1453_v19  ;;  %v1376_v34 = vor.u32 %v1725_v22, %v1373_v23  ;;  %v1761_v19 = vld [vmem:[#allocation5 + $0x2c4] sm:$0xf]  ;;  %v1581_v22 = vld [vmem:[#allocation5 + $0x348] sm:$0xf0] }
  0x5a   :  { %885 = vmatpush.bf16.msrb.mxu3 %v1168_v47  ;;  %v1368_v47 = vor.u32 %v1723_v36, %v1365_v37  ;;  %v1584_v23 = vor.u32 %v1777_v21, %v1581_v22  ;;  %v1755_v36 = vld [vmem:[#allocation5 + $0x294] sm:$0xf]  ;;  %v1493_v37 = vld [vmem:[#allocation5 + $0x298] sm:$0xf0] }
  0x5b   :  { %892 = vmatpush.bf16.msra.mxu0 %v1280_v35  ;;  %v1301_v35 = vld [vmem:[#allocation5 + $0x118] sm:$0xf0] }
  0x5c   :  { %905 = vmatpush.bf16.msra.mxu1 %v1344_v39  ;;  %v1689_v39 = vld [vmem:[#allocation5 + $0x84] sm:$0xf]  ;;  %v1796_v21 = vld [vmem:[#allocation8 + $0x58] sm:$0xff] }
  0x5d   :  { %918 = vmatpush.bf16.msra.mxu2 %v1408_v43  ;;  %886 = vmatmul.bf16.vlgmr.msrb.gmra.mxu3 %v1997_v1  ;;  %v1691_v1 = vld [vmem:[#allocation5 + $0x94] sm:$0xf]  ;;  %v1304_v43 = vor.u32 %v1707_v30, %v1301_v35  ;;  %v1232_v55 = vor.u32 %v1689_v39, %v1229_v40  ;;  %v1501_v30 = vld [vmem:[#allocation5 + $0x2a8] sm:$0xf0]  ;;  %v1568_v35 = vor.u32 %v1773_v31, %v1565_v33  ;;  %v1557_v39 = vld [vmem:[#allocation5 + $0x318] sm:$0xf0] }
  0x5e   :  { %930 = vmatpush.bf16.msra.mxu3 %v1480_v51  ;;  %v1240_v38 = vor.u32 %v1691_v1, %v1237_v25  ;;  %v1605_v51 = vld [vmem:[#allocation5 + $0x378] sm:$0xf0] }
  0x5f   :  { %893 = vmatpush.bf16.msra.mxu0 %v1272_v48  ;;  %v1767_v48 = vld [vmem:[#allocation5 + $0x2f4] sm:$0xf]  ;;  %v1509_v1 = vld [vmem:[#allocation5 + $0x2b8] sm:$0xf0] }
  0x60   :  { %906 = vmatpush.bf16.msra.mxu1 %v1336_v52  ;;  %v1721_v52 = vld [vmem:[#allocation5 + $0x184] sm:$0xf]  ;;  %v1544_v58 = vor.u32 %v1767_v48, %v1541_v49  ;;  %v1573_v25 = vld [vmem:[#allocation5 + $0x338] sm:$0xf0]  ;;  %v1790_v48 = vld [vmem:[#allocation8 + $0x28] sm:$0xff] }
  0x61   :  { %919 = vmatpush.bf16.msra.mxu2 %v1400_v57  ;;  %v1296_v57 = vor.u32 %v1705_v41, %v1293_v44  ;;  %v1753_v41 = vld [vmem:[#allocation5 + $0x284] sm:$0xf]  ;;  %v1549_v44 = vld [vmem:[#allocation5 + $0x308] sm:$0xf0] }
  0x62   :  { %931 = vmatpush.bf16.msra.mxu3 %v1472_v0  ;;  %v1360_v0 = vor.u32 %v1721_v52, %v1357_v53  ;;  %v1789_v49 = vld [vmem:[#allocation8 + $0x20] sm:$0xff]  ;;  %v1786_v52 = vld [vmem:[#allocation8 + $0x8] sm:$0xff] }
  0x63   :  { %894 = vmatpush.bf16.msra.mxu0 %v1264_v61  ;;  %v1608_v61 = vor.u32 %v1783_v50, %v1605_v51  ;;  %v1788_v50 = vld [vmem:[#allocation8 + $0x18] sm:$0xff]  ;;  %v1787_v51 = vld [vmem:[#allocation8 + $0x10] sm:$0xff] }
  0x64   :  { %907 = vmatpush.bf16.msra.mxu1 %v1328_v3  ;;  %v1781_v3 = vld [vmem:[#allocation5 + $0x364] sm:$0xf] }
  0x65   :  { %920 = vmatpush.bf16.msra.mxu2 %v1392_v7  ;;  %v1737_v7 = vld [vmem:[#allocation5 + $0x204] sm:$0xf]  ;;  %v1600_v10 = vor.u32 %v1781_v3, %v1597_v4 }
  0x66   :  { %932 = vmatpush.bf16.msra.mxu3 %v1464_v15  ;;  %v1589_v15 = vld [vmem:[#allocation5 + $0x358] sm:$0xf0] }
  0x67   :  { %895 = vmatpush.bf16.msra.mxu0 %v1256_v11  ;;  %v1763_v11 = vld [vmem:[#allocation5 + $0x2d4] sm:$0xf]  ;;  %v1592_v18 = vor.u32 %v1779_v14, %v1589_v15 }
  0x68   :  { %908 = vmatpush.bf16.msra.mxu1 %v1320_v16  ;;  %v1424_v16 = vor.u32 %v1737_v7, %v1421_v8  ;;  %v1528_v17 = vor.u32 %v1763_v11, %v1525_v12  ;;  %v1800_v7 = vld [vmem:[#allocation8 + $0x78] sm:$0xff]  ;;  %v1798_v11 = vld [vmem:[#allocation8 + $0x68] sm:$0xff] }
  0x69   :  { %921 = vmatpush.bf16.msra.mxu2 %v1384_v20  ;;  %v1517_v20 = vld [vmem:[#allocation5 + $0x2c8] sm:$0xf0] }
  0x6a   :  { %933 = vmatpush.bf16.msra.mxu3 %v1456_v26 }
  0x6b   :  { %896 = vmatpush.bf16.msra.mxu0 %v1248_v24  ;;  %v1759_v24 = vld [vmem:[#allocation5 + $0x2b4] sm:$0xf] }
  0x6c   :  { %909 = vmatpush.bf16.msra.mxu1 %v1312_v28  ;;  %v1512_v26 = vor.u32 %v1759_v24, %v1509_v1  ;;  %v1757_v28 = vld [vmem:[#allocation5 + $0x2a4] sm:$0xf]  ;;  %v1794_v24 = vld [vmem:[#allocation8 + $0x48] sm:$0xff] }
  0x6d   :  { %922 = vmatpush.bf16.msra.mxu2 %v1376_v34  ;;  %v1504_v34 = vor.u32 %v1757_v28, %v1501_v30 }
  0x6e   :  { %934 = vmatpush.bf16.msra.mxu3 %v1448_v42  ;;  %v1485_v42 = vld [vmem:[#allocation5 + $0x288] sm:$0xf0] }
  0x6f   :  { %897 = vmatpush.bf16.msra.mxu0 %v1240_v38  ;;  %v1771_v38 = vld [vmem:[#allocation5 + $0x314] sm:$0xf]  ;;  %v1488_v45 = vor.u32 %v1753_v41, %v1485_v42 }
  0x70   :  { %910 = vmatpush.bf16.msra.mxu1 %v1304_v43  ;;  %v1560_v40 = vor.u32 %v1771_v38, %v1557_v39  ;;  %v1769_v43 = vld [vmem:[#allocation5 + $0x304] sm:$0xf] }
  0x71   :  { %923 = vmatpush.bf16.msra.mxu2 %v1368_v47  ;;  %v1552_v46 = vor.u32 %v1769_v43, %v1549_v44  ;;  %v1791_v47 = vld [vmem:[#allocation8 + $0x30] sm:$0xff] }
  0x72   :  { %935 = vmatpush.bf16.msra.mxu3 %v1440_v56 }
  0x73   :  { %898 = vmatpush.bf16.msra.mxu0 %v1232_v55 }
  0x74   :  { %911 = vmatpush.bf16.msra.mxu1 %v1296_v57  ;;  %v1785_v57 = vld [vmem:[#allocation8] sm:$0xff] }
  0x75   :  { %924 = vmatpush.bf16.msra.mxu2 %v1360_v0 }
  0x76   :  { %899 = vmatmul.bf16.vlgmr.msra.gmra.mxu0 %v1999_v2  ;;  %936 = vmatpush.bf16.msra.mxu3 %v1432_v5  ;;  %v1520_v2 = vor.u32 %v1761_v19, %v1517_v20  ;;  %v1797_v19 = vld [vmem:[#allocation8 + $0x60] sm:$0xff] }
  0x77   :  { %943 = vmatpush.bf16.msrb.mxu0 %v1544_v58  ;;  %912 = vmatmul.bf16.vlgmr.msra.gmra.mxu1 %v1994_v54  ;;  %v1775_v54 = vld [vmem:[#allocation5 + $0x334] sm:$0xf]  ;;  %v196_v58 = vld [vmem:[#allocation7] sm:$0x3] }
  0x78   :  { %956 = vmatpush.bf16.msrb.mxu1 %v1608_v61  ;;  %925 = vmatmul.bf16.vlgmr.msra.gmra.mxu2 %v2002_v13  ;;  %v1576_v13 = vor.u32 %v1775_v54, %v1573_v25  ;;  %v1793_v25 = vld [vmem:[#allocation8 + $0x40] sm:$0xff] }
  0x79   :  { %1105 = vmatpush.bf16.msrb.mxu2 %v1792_v9  ;;  %v1799_v9 = vld [vmem:[#allocation8 + $0x70] sm:$0xff] }
  0x7a   :  { %937 = vmatpush.bf16.msra.mxu3 %v1424_v16 }
  0x7b   :  { %944 = vmatpush.bf16.msrb.mxu0 %v1536_v6 }
  0x7c   :  { %957 = vmatpush.bf16.msrb.mxu1 %v1600_v10 }
  0x7d   :  { %938 = vmatmul.bf16.vlgmr.msra.gmra.mxu3 %v2006_v27  ;;  %v1496_v27 = vor.u32 %v1755_v36, %v1493_v37  ;;  %1106 = vmatpush.bf16.msrb.mxu2 %v1791_v47 }
  0x7e   :  { %1118 = vmatpush.bf16.msrb.mxu3 %v1800_v7 }
  0x7f   :  { %945 = vmatpush.bf16.msrb.mxu0 %v1528_v17 }
  0x80   :  { %958 = vmatpush.bf16.msrb.mxu1 %v1592_v18 }
  0x81   :  { %1107 = vmatpush.bf16.msrb.mxu2 %v1790_v48 }
  0x82   :  { %1119 = vmatpush.bf16.msrb.mxu3 %v1799_v9 }
  0x83   :  { %946 = vmatpush.bf16.msrb.mxu0 %v1520_v2  ;;  %v1795_v2 = vld [vmem:[#allocation8 + $0x50] sm:$0xff] }
  0x84   :  { %959 = vmatpush.bf16.msrb.mxu1 %v1584_v23 }
  0x85   :  { %1108 = vmatpush.bf16.msrb.mxu2 %v1789_v49  ;;  %v1810_v49 = vld [vmem:[%s2032_s4] ss:$0 sm:$0xff]  ;;  %s1149_s4 = sshll.u32 %s2033_s5, 4  ;;  %s1150_s4 = int_to_ptr.hbm [resolvable:$true] %s1149_s4 }
  0x86   :  { %1120 = vmatpush.bf16.msrb.mxu3 %v1798_v11 }
  0x87   :  { %947 = vmatpush.bf16.msrb.mxu0 %v1512_v26  ;;  %v199_v26 = vperm.slane %v196_v58, 1 }
  0x88   :  { %960 = vmatpush.bf16.msrb.mxu1 %v1576_v13 }
  0x89   :  { %1109 = vmatpush.bf16.msrb.mxu2 %v1788_v50 }
  0x8a   :  { %1121 = vmatpush.bf16.msrb.mxu3 %v1797_v19 }
  0x8b   :  { %948 = vmatpush.bf16.msrb.mxu0 %v1504_v34 }
  0x8c   :  { %961 = vmatpush.bf16.msrb.mxu1 %v1568_v35 }
  0x8d   :  { %1110 = vmatpush.bf16.msrb.mxu2 %v1787_v51 }
  0x8e   :  { %1122 = vmatpush.bf16.msrb.mxu3 %v1796_v21 }
  0x8f   :  { %949 = vmatpush.bf16.msrb.mxu0 %v1496_v27 }
  0x90   :  { %962 = vmatpush.bf16.msrb.mxu1 %v1560_v40 }
  0x91   :  { %1111 = vmatpush.bf16.msrb.mxu2 %v1786_v52 }
  0x92   :  { %1123 = vmatpush.bf16.msrb.mxu3 %v1795_v2 }
  0x93   :  { %950 = vmatpush.bf16.msrb.mxu0 %v1488_v45 }
  0x94   :  { %963 = vmatpush.bf16.msrb.mxu1 %v1552_v46 }
  0x95   :  { %1112 = vmatpush.bf16.msrb.mxu2 %v1785_v57 }
  0x96   :  { %951 = vmatmul.bf16.vlgmr.msrb.gmra.mxu0 %v2008_v29  ;;  %v198_v29 = vperm.slane %v196_v58, 0  ;;  %1124 = vmatpush.bf16.msrb.mxu3 %v1794_v24 }
  0x97   :  { %964 = vmatmul.bf16.vlgmr.msrb.gmra.mxu1 %v2010_v32 }
  0x9a   :  { %1125 = vmatpush.bf16.msrb.mxu3 %v1793_v25 }
  0xb3   :  { %v796_v53 = vpop.f32.mrf.mxu0 }
  0xb4   :  { %v809_v55 = vpop.f32.mrf.mxu1  ;;  %v797_v61 = vadd.f32 %v796_v53, %v198_v29 }
  0xb6   :  { %v810_v63 = vadd.f32 %v809_v55, %v797_v61 }
  0xbb   :  { %v822_v56 = vpop.f32.mrf.mxu2  ;;  %v798_v32 = vpop.f32.mrf.mxu0 }
  0xbc   :  { %v811_v59 = vpop.f32.mrf.mxu1  ;;  %v823_v3 = vadd.f32 %v822_v56, %v810_v63 }
  0xc0   :  { %v835_v60 = vpop.f32.mrf.mxu3 }
  0xc1   :  { %v836_v4 = vadd.f32 %v835_v60, %v823_v3 }
  0xc3   :  { %v824_v62 = vpop.f32.mrf.mxu2 }
  0xc8   :  { %v837_v0 = vpop.f32.mrf.mxu3 }
  0xd3   :  { %v848_v5 = vpop.f32.mrf.mxu0 }
  0xd4   :  { %v861_v6 = vpop.f32.mrf.mxu1  ;;  %v849_v8 = vadd.f32 %v848_v5, %v836_v4 }
  0xd6   :  { %v862_v10 = vadd.f32 %v861_v6, %v849_v8 }
  0xdb   :  { %v874_v12 = vpop.f32.mrf.mxu2  ;;  %v850_v15 = vpop.f32.mrf.mxu0 }
  0xdc   :  { %v875_v14 = vadd.f32 %v874_v12, %v862_v10  ;;  %v863_v16 = vpop.f32.mrf.mxu1 }
  0xde   :  { %v969_v17 = vmax.f32 %v875_v14, 0.0 }
  0xe0   :  { %v971_v18 = vpack.c.bf16 %v969_v17, %v969_v17  ;;  %v887_v20 = vpop.f32.mrf.mxu3 }
  0xe1   :  { %v888_v31 = vadd.f32 %v887_v20, %v199_v26 }
  0xe2   :  { %1113 = vmatmul.bf16.vlgmr.msrb.gmra.mxu2 %v971_v18 }
  0xe3   :  { %v876_v22 = vpop.f32.mrf.mxu2 }
  0xe8   :  { %v889_v23 = vpop.f32.mrf.mxu3 }
  0xf3   :  { %v900_v1 = vpop.f32.mrf.mxu0 }
  0xf4   :  { %v913_v54 = vpop.f32.mrf.mxu1  ;;  %v901_v34 = vadd.f32 %v900_v1, %v888_v31 }
  0xf6   :  { %v914_v36 = vadd.f32 %v913_v54, %v901_v34 }
  0xfb   :  { %v902_v13 = vpop.f32.mrf.mxu0  ;;  %v926_v28 = vpop.f32.mrf.mxu2 }
  0xfc   :  { %v915_v30 = vpop.f32.mrf.mxu1  ;;  %v927_v38 = vadd.f32 %v926_v28, %v914_v36 }
 0x100   :  { %v939_v33 = vpop.f32.mrf.mxu3 }
 0x101   :  { %v940_v39 = vadd.f32 %v939_v33, %v927_v38 }
 0x103   :  { %v928_v35 = vpop.f32.mrf.mxu2 }
 0x108   :  { %v941_v37 = vpop.f32.mrf.mxu3 }
 0x113   :  { %v952_v27 = vpop.f32.mrf.mxu0 }
 0x114   :  { %v953_v40 = vadd.f32 %v952_v27, %v940_v39  ;;  %v965_v41 = vpop.f32.mrf.mxu1 }
 0x116   :  { %v966_v42 = vadd.f32 %v965_v41, %v953_v40 }
 0x118   :  { %v970_v43 = vmax.f32 %v966_v42, 0.0 }
 0x11a   :  { %v972_v44 = vpack.c.bf16 %v970_v43, %v970_v43 }
 0x11b   :  { %v954_v45 = vpop.f32.mrf.mxu0 }
 0x11c   :  { %v967_v46 = vpop.f32.mrf.mxu1  ;;  %1126 = vmatmul.bf16.vlgmr.msrb.gmra.mxu3 %v972_v44 }
 0x165   :  { %v1114_v47 = vpop.f32.mrf.mxu2 }
 0x166   :  { %v1115_v50 = vadd.f32 %v1810_v49, %v1114_v47 }
 0x16d   :  { %v1116_v48 = vpop.f32.mrf.mxu2 }
 0x19f   :  { %v1127_v51 = vpop.f32.mrf.mxu3 }
 0x1a0   :  { %v1128_v52 = vadd.f32 %v1127_v51, %v1115_v50 }
 0x1a2   :  { %1131 = vmax.xlane.f32.xlu0 %v1128_v52 }
 0x1a7   :  { %v1129_v53 = vpop.f32.mrf.mxu3 }
 0x215   :  { %v1132_v55 = vpop.xlane.xlu0 %1131 }
 0x216   :  { %v1133_v56 = vsub.f32 %v1128_v52, %v1132_v55 }
 0x218   :  { %v1134_v57 = vmul.f32 1.442695, %v1133_v56 }
 0x21a   :  { %1811 = vpow2.f32 %v1134_v57 }
 0x220   :  { %v1812_v58 = vpop.eup %1811 }
 0x221   :  { %1136 = vadd.xlane.f32.xlu0 %v1812_v58 }
 0x294   :  { %v1137_v29 = vpop.xlane.xlu0 %1136 }
 0x295   :  { %1813 = vlog2.f32 %v1137_v29 }
 0x29b   :  { %v1814_v32 = vpop.eup %1813 }
 0x29c   :  { %v1139_v59 = vmul.f32 0.6931472, %v1814_v32 }
 0x29e   :  { %v1140_v60 = vsub.f32 %v1133_v56, %v1139_v59 }
 0x2a0   :  { %1141 = vst [vmem:[#allocation10] sm:$0xff] %v1140_v60 }
 0x2a1   :  { %1152 = dma.vmem_to_hbm [thread:$0]  %s1148_s16, 128, %s1150_s4, [#allocation4]  }
 0x2a2   :  { %1941 = dma.done.wait [#allocation4], 128  }
 0x2a3   :  { %1942 = vsyncadd [#allocation4], 4294967168 }
 0x2a4   :  { %1157 = vsyncpa [#allocation3], 1 }
 0x2a5   :  { %1158 = vsyncpa [#allocation6], 1 }
 0x2a6   :  { %1159 = vsyncpa [#allocation9], 1 }
 0x2a7   :  { %1160 = vsyncpa [#allocation4], 1 }

</bundles_post_ra>
